<compile_context>
chip_gen: v6e
topology: v6e:2x2x1
jax: 0.10.0
libtpu: 0.0.40
codegen_flags: <defaults>
</compile_context>

<pallas_src>
import jax
import jax.numpy as jnp
from jax.experimental import pallas as pl
from jax.experimental.pallas import tpu as pltpu


def actor_mlp_kernel(xT_ref,
                     w1_ref, b1_ref,
                     w2_ref, b2_ref,
                     w3_ref, b3_ref,
                     w4d_ref, b4d_ref,
                     out_ref):
    """One batch tile, transposed layout.

      xT_ref : (3,  TB)   input features^T (batch on lanes)
      wK_ref : (out, in)  transposed Linear weights
      bK_ref : (out, 1)   bias columns (broadcast over lanes)
      w4d_ref: (16, 1)    w4[:,1] - w4[:,0]  (folded final layer)
      b4d_ref: (1, 1)     b4[1]   - b4[0]
      out_ref: (2,  TB)   [p0; p1] probabilities
    """
    xT = xT_ref[...]                                                             # (3, TB) f32

    h1 = jnp.tanh(jnp.dot(w1_ref[...], xT,
                          preferred_element_type=jnp.float32) + b1_ref[...])     # (64, TB)
    h2 = jnp.tanh(jnp.dot(w2_ref[...], h1,
                          preferred_element_type=jnp.float32) + b2_ref[...])     # (32, TB)
    h3 = jnp.tanh(jnp.dot(w3_ref[...], h2,
                          preferred_element_type=jnp.float32) + b3_ref[...])     # (16, TB)

    # Final 16->2 layer folded to a logit difference, computed on the VPU + sublane reduce.
    d = jnp.sum(h3 * w4d_ref[...], axis=0, keepdims=True) + b4d_ref[...]         # (1, TB)

    # softmax over 2 classes == sigmoid of the logit difference (exact identity, EUP tanh).
    p1 = 0.5 * (jnp.tanh(0.5 * d) + 1.0)                                         # sigmoid(d)
    out_ref[...] = jnp.concatenate([1.0 - p1, p1], axis=0).astype(out_ref.dtype)  # one lane-dense store


def actor_forward(x, params, tb=2048):
    """x: (B, 3) float32.  Returns softmax action probabilities, shape (B, 2)."""
    (w1, b1), (w2, b2), (w3, b3), (w4, b4) = params
    B = x.shape[0]
    x = x.astype(jnp.float32)

    # One-time layout plumbing in plain JAX (outside the kernel).
    w1t = w1.T.astype(jnp.float32)                        # (64, 3)
    w2t = w2.T.astype(jnp.float32)                        # (32, 64)
    w3t = w3.T.astype(jnp.float32)                        # (16, 32)
    b1c = b1.reshape(-1, 1).astype(jnp.float32)           # (64, 1)
    b2c = b2.reshape(-1, 1).astype(jnp.float32)           # (32, 1)
    b3c = b3.reshape(-1, 1).astype(jnp.float32)           # (16, 1)
    w4d = (w4[:, 1] - w4[:, 0]).reshape(-1, 1).astype(jnp.float32)   # (16, 1)
    b4f = b4.reshape(-1).astype(jnp.float32)
    b4d = (b4f[1] - b4f[0]).reshape(1, 1)                 # (1, 1)

    # Batch tile: multiple of 128 (lane-dense).  Largest live intermediate per step is
    # h1 = (64, TB) f32 (512 KiB at TB=2048) -> comfortably inside VMEM on v5e/v6e/v7x.
    TB = max(128, (int(tb) // 128) * 128)
    n_tiles = -(-B // TB)
    B_pad = n_tiles * TB

    # Transposed, zero-padded input slab: (3, B_pad).  Padded columns produce garbage
    # probabilities that are sliced off below; zeros cannot create NaNs.
    xT = jnp.pad(x.T, ((0, 0), (0, B_pad - B)))

    def const_spec(a):
        return pl.BlockSpec(a.shape, lambda i: (0,) * a.ndim)

    flops_per_row = 2 * (3 * 64 + 64 * 32 + 32 * 16 + 16)
    cost = pl.CostEstimate(
        flops=flops_per_row * B_pad,
        transcendentals=(64 + 32 + 16 + 1) * B_pad,
        bytes_accessed=(3 + 2) * 4 * B_pad + 4 * (64 * 3 + 64 + 32 * 64 + 32 + 16 * 32 + 16 + 17),
    )

    out_t = pl.pallas_call(
        actor_mlp_kernel,
        out_shape=jax.ShapeDtypeStruct((2, B_pad), jnp.float32),
        grid_spec=pltpu.PrefetchScalarGridSpec(
            num_scalar_prefetch=0,
            grid=(n_tiles,),
            in_specs=[pl.BlockSpec((3, TB), lambda i: (0, i)),   # stream x tiles
                      const_spec(w1t), const_spec(b1c),          # weights: constant block
                      const_spec(w2t), const_spec(b2c),          #  index -> DMA'd once,
                      const_spec(w3t), const_spec(b3c),          #  VMEM-resident all grid
                      const_spec(w4d), const_spec(b4d)],
            out_specs=pl.BlockSpec((2, TB), lambda i: (0, i)),   # lane-dense output tile
        ),
        compiler_params=pltpu.CompilerParams(
            dimension_semantics=("parallel",)),
        cost_estimate=cost,
    )(xT, w1t, b1c, w2t, b2c, w3t, b3c, w4d, b4d)

    return out_t[:, :B].T                                  # (B, 2)


def init_params(key):
    """Deterministic init matching the nn.Linear shapes of Actor.__init__.
    PyTorch uses U(-1/sqrt(fan_in), 1/sqrt(fan_in)); we mimic that.
    Weights stored as (in_features, out_features), biases as (out_features,)."""
    dims = [(3, 64), (64, 32), (32, 16), (16, 2)]
    params = []
    for (fan_in, fan_out) in dims:
        key, kw, kb = jax.random.split(key, 3)
        bound = 1.0 / jnp.sqrt(jnp.float32(fan_in))
        w = jax.random.uniform(kw, (fan_in, fan_out), jnp.float32, -bound, bound)
        b = jax.random.uniform(kb, (fan_out,), jnp.float32, -bound, bound)
        params.append((w, b))
    return params


def actor_forward_ref(x, params):
    """Plain-JAX reference for sanity checking."""
    (w1, b1), (w2, b2), (w3, b3), (w4, b4) = params
    h = jnp.tanh(x @ w1 + b1)
    h = jnp.tanh(h @ w2 + b2)
    h = jnp.tanh(h @ w3 + b3)
    logits = h @ w4 + b4
    return jax.nn.softmax(logits, axis=1)


if __name__ == "__main__":
    key = jax.random.PRNGKey(0)
    key, kx = jax.random.split(key)

    batch = 200   # intentionally NOT a multiple of the tile -> exercises ragged padding
    x = jax.random.normal(kx, (batch, 3), dtype=jnp.float32)
    params = init_params(key)

    # Small tile so the demo runs a multi-step pipelined grid.
    out = actor_forward(x, params, tb=128)
    out = jax.block_until_ready(out)

    ref = actor_forward_ref(x, params)
    assert out.shape == (batch, 2)
    assert jnp.allclose(out, ref, atol=1e-5, rtol=1e-5), "mismatch vs reference"
    assert jnp.allclose(jnp.sum(out, axis=1), 1.0, atol=1e-6)

    # Also sanity-check the default (large-tile, B < TB) configuration.
    out2 = jax.block_until_ready(actor_forward(x, params))
    assert jnp.allclose(out2, ref, atol=1e-5, rtol=1e-5), "mismatch vs reference (default tile)"

    print("KERNEL_OK")
</pallas_src>

<mosaic_0001>
module attributes {stable_mosaic.version = 11 : i64} {
  func.func @actor_mlp_kernel(%arg0: i32, %arg1: memref<3x128xf32, #tpu.memory_space<vmem>>, %arg2: memref<64x3xf32, #tpu.memory_space<vmem>>, %arg3: memref<64x1xf32, #tpu.memory_space<vmem>>, %arg4: memref<32x64xf32, #tpu.memory_space<vmem>>, %arg5: memref<32x1xf32, #tpu.memory_space<vmem>>, %arg6: memref<16x32xf32, #tpu.memory_space<vmem>>, %arg7: memref<16x1xf32, #tpu.memory_space<vmem>>, %arg8: memref<16x1xf32, #tpu.memory_space<vmem>>, %arg9: memref<1x1xf32, #tpu.memory_space<vmem>>, %arg10: memref<2x128xf32, #tpu.memory_space<vmem>>) attributes {dimension_semantics = [#tpu.dimension_semantics<parallel>], iteration_bounds = array<i64: 2>, scalar_prefetch = 0 : i64, scratch_operands = 0 : i64, tpu.core_type = #tpu.core_type<tc>, window_params = [{transform_indices = @transform_0, window_bounds = array<i64: 3, 128>}, {pipeline_mode = #tpu.pipeline_mode<synchronous>, transform_indices = @transform_1, window_bounds = array<i64: 64, 3>}, {pipeline_mode = #tpu.pipeline_mode<synchronous>, transform_indices = @transform_2, window_bounds = array<i64: 64, 1>}, {pipeline_mode = #tpu.pipeline_mode<synchronous>, transform_indices = @transform_3, window_bounds = array<i64: 32, 64>}, {pipeline_mode = #tpu.pipeline_mode<synchronous>, transform_indices = @transform_4, window_bounds = array<i64: 32, 1>}, {pipeline_mode = #tpu.pipeline_mode<synchronous>, transform_indices = @transform_5, window_bounds = array<i64: 16, 32>}, {pipeline_mode = #tpu.pipeline_mode<synchronous>, transform_indices = @transform_6, window_bounds = array<i64: 16, 1>}, {pipeline_mode = #tpu.pipeline_mode<synchronous>, transform_indices = @transform_7, window_bounds = array<i64: 16, 1>}, {pipeline_mode = #tpu.pipeline_mode<synchronous>, transform_indices = @transform_8, window_bounds = array<i64: 1, 1>}, {transform_indices = @transform_9, window_bounds = array<i64: 2, 128>}]} {
    %c0 = arith.constant 0 : index
    %c0_0 = arith.constant 0 : index
    %0 = vector.load %arg1[%c0, %c0_0] : memref<3x128xf32, #tpu.memory_space<vmem>>, vector<3x128xf32>
    %c0_1 = arith.constant 0 : index
    %c0_2 = arith.constant 0 : index
    %1 = vector.load %arg2[%c0_1, %c0_2] : memref<64x3xf32, #tpu.memory_space<vmem>>, vector<64x3xf32>
    %cst = arith.constant dense<0.000000e+00> : vector<64x128xf32>
    %2 = tpu.matmul %1, %0, %cst {dimension_numbers = #tpu.dot_dimension_numbers<[1], [0], [0], [1], [0, 0, 1, 1], [], []>} : vector<64x3xf32>, vector<3x128xf32>, vector<64x128xf32> -> vector<64x128xf32>
    %c0_3 = arith.constant 0 : index
    %c0_4 = arith.constant 0 : index
    %3 = vector.load %arg3[%c0_3, %c0_4] : memref<64x1xf32, #tpu.memory_space<vmem>>, vector<64x1xf32>
    %4 = vector.broadcast %3 : vector<64x1xf32> to vector<64x128xf32>
    %5 = arith.addf %2, %4 : vector<64x128xf32>
    %6 = math.tanh %5 : vector<64x128xf32>
    %c0_5 = arith.constant 0 : index
    %c0_6 = arith.constant 0 : index
    %7 = vector.load %arg4[%c0_5, %c0_6] : memref<32x64xf32, #tpu.memory_space<vmem>>, vector<32x64xf32>
    %cst_7 = arith.constant dense<0.000000e+00> : vector<32x128xf32>
    %8 = tpu.matmul %7, %6, %cst_7 {dimension_numbers = #tpu.dot_dimension_numbers<[1], [0], [0], [1], [0, 0, 1, 1], [], []>} : vector<32x64xf32>, vector<64x128xf32>, vector<32x128xf32> -> vector<32x128xf32>
    %c0_8 = arith.constant 0 : index
    %c0_9 = arith.constant 0 : index
    %9 = vector.load %arg5[%c0_8, %c0_9] : memref<32x1xf32, #tpu.memory_space<vmem>>, vector<32x1xf32>
    %10 = vector.broadcast %9 : vector<32x1xf32> to vector<32x128xf32>
    %11 = arith.addf %8, %10 : vector<32x128xf32>
    %12 = math.tanh %11 : vector<32x128xf32>
    %c0_10 = arith.constant 0 : index
    %c0_11 = arith.constant 0 : index
    %13 = vector.load %arg6[%c0_10, %c0_11] : memref<16x32xf32, #tpu.memory_space<vmem>>, vector<16x32xf32>
    %cst_12 = arith.constant dense<0.000000e+00> : vector<16x128xf32>
    %14 = tpu.matmul %13, %12, %cst_12 {dimension_numbers = #tpu.dot_dimension_numbers<[1], [0], [0], [1], [0, 0, 1, 1], [], []>} : vector<16x32xf32>, vector<32x128xf32>, vector<16x128xf32> -> vector<16x128xf32>
    %c0_13 = arith.constant 0 : index
    %c0_14 = arith.constant 0 : index
    %15 = vector.load %arg7[%c0_13, %c0_14] : memref<16x1xf32, #tpu.memory_space<vmem>>, vector<16x1xf32>
    %16 = vector.broadcast %15 : vector<16x1xf32> to vector<16x128xf32>
    %17 = arith.addf %14, %16 : vector<16x128xf32>
    %18 = math.tanh %17 : vector<16x128xf32>
    %c0_15 = arith.constant 0 : index
    %c0_16 = arith.constant 0 : index
    %19 = vector.load %arg8[%c0_15, %c0_16] : memref<16x1xf32, #tpu.memory_space<vmem>>, vector<16x1xf32>
    %20 = vector.broadcast %19 : vector<16x1xf32> to vector<16x128xf32>
    %21 = arith.mulf %18, %20 : vector<16x128xf32>
    %cst_17 = arith.constant dense<0.000000e+00> : vector<128xf32>
    %22 = vector.multi_reduction <add>, %21, %cst_17 [0] : vector<16x128xf32> to vector<128xf32>
    %23 = vector.shape_cast %22 : vector<128xf32> to vector<1x128xf32>
    %c0_18 = arith.constant 0 : index
    %c0_19 = arith.constant 0 : index
    %24 = vector.load %arg9[%c0_18, %c0_19] : memref<1x1xf32, #tpu.memory_space<vmem>>, vector<1x1xf32>
    %25 = vector.broadcast %24 : vector<1x1xf32> to vector<1x128xf32>
    %26 = arith.addf %23, %25 : vector<1x128xf32>
    %cst_20 = arith.constant 5.000000e-01 : f32
    %27 = vector.broadcast %cst_20 : f32 to vector<1x128xf32>
    %28 = arith.mulf %27, %26 : vector<1x128xf32>
    %29 = math.tanh %28 : vector<1x128xf32>
    %cst_21 = arith.constant 1.000000e+00 : f32
    %30 = vector.broadcast %cst_21 : f32 to vector<1x128xf32>
    %31 = arith.addf %29, %30 : vector<1x128xf32>
    %cst_22 = arith.constant 5.000000e-01 : f32
    %32 = vector.broadcast %cst_22 : f32 to vector<1x128xf32>
    %33 = arith.mulf %32, %31 : vector<1x128xf32>
    %cst_23 = arith.constant 1.000000e+00 : f32
    %34 = vector.broadcast %cst_23 : f32 to vector<1x128xf32>
    %35 = arith.subf %34, %33 : vector<1x128xf32>
    %36 = tpu.concatenate %35, %33 in 0 : vector<1x128xf32>, vector<1x128xf32> -> vector<2x128xf32>
    %c0_24 = arith.constant 0 : index
    %c0_25 = arith.constant 0 : index
    %37 = vector.load %arg10[%c0_24, %c0_25] : memref<2x128xf32, #tpu.memory_space<vmem>>, vector<2x128xf32>
    tpu.vector_store %arg10[%c0_24, %c0_25], %36 {strides = array<i32>} : memref<2x128xf32, #tpu.memory_space<vmem>>, vector<2x128xf32>,
    return
  }
  func.func @transform_0(%arg0: i32) -> (i32, i32) {
    %c0_i32 = arith.constant 0 : i32
    %c0_i32_0 = arith.constant 0 : i32
    return %c0_i32, %arg0 : i32, i32
  }
  func.func @transform_1(%arg0: i32) -> (i32, i32) {
    %c0_i32 = arith.constant 0 : i32
    %c0_i32_0 = arith.constant 0 : i32
    %c0_i32_1 = arith.constant 0 : i32
    return %c0_i32, %c0_i32_0 : i32, i32
  }
  func.func @transform_2(%arg0: i32) -> (i32, i32) {
    %c0_i32 = arith.constant 0 : i32
    %c0_i32_0 = arith.constant 0 : i32
    %c0_i32_1 = arith.constant 0 : i32
    return %c0_i32, %c0_i32_0 : i32, i32
  }
  func.func @transform_3(%arg0: i32) -> (i32, i32) {
    %c0_i32 = arith.constant 0 : i32
    %c0_i32_0 = arith.constant 0 : i32
    %c0_i32_1 = arith.constant 0 : i32
    return %c0_i32, %c0_i32_0 : i32, i32
  }
  func.func @transform_4(%arg0: i32) -> (i32, i32) {
    %c0_i32 = arith.constant 0 : i32
    %c0_i32_0 = arith.constant 0 : i32
    %c0_i32_1 = arith.constant 0 : i32
    return %c0_i32, %c0_i32_0 : i32, i32
  }
  func.func @transform_5(%arg0: i32) -> (i32, i32) {
    %c0_i32 = arith.constant 0 : i32
    %c0_i32_0 = arith.constant 0 : i32
    %c0_i32_1 = arith.constant 0 : i32
    return %c0_i32, %c0_i32_0 : i32, i32
  }
  func.func @transform_6(%arg0: i32) -> (i32, i32) {
    %c0_i32 = arith.constant 0 : i32
    %c0_i32_0 = arith.constant 0 : i32
    %c0_i32_1 = arith.constant 0 : i32
    return %c0_i32, %c0_i32_0 : i32, i32
  }
  func.func @transform_7(%arg0: i32) -> (i32, i32) {
    %c0_i32 = arith.constant 0 : i32
    %c0_i32_0 = arith.constant 0 : i32
    %c0_i32_1 = arith.constant 0 : i32
    return %c0_i32, %c0_i32_0 : i32, i32
  }
  func.func @transform_8(%arg0: i32) -> (i32, i32) {
    %c0_i32 = arith.constant 0 : i32
    %c0_i32_0 = arith.constant 0 : i32
    %c0_i32_1 = arith.constant 0 : i32
    return %c0_i32, %c0_i32_0 : i32, i32
  }
  func.func @transform_9(%arg0: i32) -> (i32, i32) {
    %c0_i32 = arith.constant 0 : i32
    %c0_i32_0 = arith.constant 0 : i32
    return %c0_i32, %arg0 : i32, i32
  }
}

</mosaic_0001>

<bundles_post_ra>
// kernel: tpu_custom_call.1
= control target key start
LH: loop header
LB: loop body
LE: loop exit
PB: predicated region body
PF: predicated region fallthrough
CT: control target
= control target key end

     0   :  { %s1355_s0 = inlined_call_operand.vmem [shape: f32[3,256], index: 0, kind: input, shape index: {}]   ;;  %s1356_s1 = inlined_call_operand.vmem [shape: f32[64,3], index: 1, kind: input, shape index: {}]   ;;  %s1357_s2 = inlined_call_operand.vmem [shape: f32[64,1], index: 2, kind: input, shape index: {}]   ;;  %s1358_s3 = inlined_call_operand.vmem [shape: f32[32,64], index: 3, kind: input, shape index: {}]   ;;  %s1359_s4 = inlined_call_operand.vmem [shape: f32[32,1], index: 4, kind: input, shape index: {}]   ;;  %s1360_s5 = inlined_call_operand.vmem [shape: f32[16,32], index: 5, kind: input, shape index: {}]   ;;  %s1361_s6 = inlined_call_operand.vmem [shape: f32[16,1], index: 6, kind: input, shape index: {}]   ;;  %s1362_s7 = inlined_call_operand.vmem [shape: f32[16,1], index: 7, kind: input, shape index: {}]   ;;  %s1363_s8 = inlined_call_operand.<no memory space> [shape: f32[1,1], index: 8, kind: input, shape index: {}]   ;;  %s1364_s9 = inlined_call_operand.hbm [shape: f32[2,256], index: 9, kind: output, shape index: {}]  }
   0x1   :  { %v14_v0 = vstv %s1363_s8 }
   0x2   :  { %15 = vst [vmem:[#allocation2] sm:$0x1] %v14_v0 }
   0x3   :  { %16 = vsyncpa [#allocation4], 0 }
   0x4   :  { %18 = vsyncpa [#allocation4 + $0x1], 0  ;;  %s1158_s11 = smov 0   ;;  %s1160_s12 = smov 0  }
   0x5   :  { %s1162_s13 = smov 0   ;;  %s1164_s14 = smov 0  }
   0x6 LB: > { %s1179_s8 = sadd.s32 4294967295, %s1101_s14   ;;  %s870_s15 = sadd.s32 4294967294, %s1101_s14   ;;  %s1101_s14 = sphi %s1164_s14, %s1370_s14   ;;  %s1097_s13 = sphi %s1162_s13, %s1369_s13   ;;  %s1093_s12 = sphi %s1160_s12, %s1368_s12   ;;  %s1089_s11 = sphi %s1158_s11, %s1367_s11  }
   0x7   : > { %s1183_s16 = sadd.s32 1, %s1101_s14   ;;  %s225_s17 = sadd.s32 1, %s1097_s13 }
   0x8   : > { %s222_s18 = ssub.s32 %s1101_s14, %s1183_s16  ;;  %p235_p0 = scmp.ne.s32.totalorder %s1097_s13, %s1093_s12 }
   0x9   : > { %p223_p1 = scmp.eq.s32.totalorder %s222_s18, 0  ;;  %p236_p2 = scmp.eq.s32.totalorder %s1179_s8, 1 }
   0xa   : > { %p241_p3 = scmp.ne.s32.totalorder %s1093_s12, %s1089_s11  ;;  %p242_p4 = scmp.eq.s32.totalorder %s870_s15, 1 }
   0xb   : > { %s1194_s19 = scalar_select %p223_p1, %s1097_s13, %s225_s17  }
   0xc   : > { %p1196_p5 = por %p236_p2, %p235_p0  ;;  %p1200_p6 = por %p242_p4, %p241_p3 }
   0xd   : > { %p873_p7 = scmp.ge.s32.totalorder %s1101_s14, 1  ;;  %p291_p8 = scmp.lt.s32.totalorder %s1101_s14, 3 }
   0xf   : > { %p292_p9 = pnand %p873_p7, %p291_p8 }
  0x10   : > { %p326_p10 = scmp.lt.s32.totalorder (!%p292_p9), %s1179_s8, 1  ;;  %s323_s22 = sand.u32 (!%p292_p9), 1, %s1093_s12  }
  0x11   : > { %295 = sbr.rel (%p292_p9) target bundleno = 752 (0x2f0), region = 56  ;;  %s874_s23 = sshll.u32 (!%p292_p9), %s323_s22, 1 }
  0x12   : > { %s892_s25 = sshll.u32 (!%p292_p9), %s1179_s8, 5  ;;  %s325_s26 = scalar_lea.vmem (!%p292_p9), [#allocation3], %s874_s23 }
  0x13   : > { %s1320_s30 = scalar_lea.hbm (!%p292_p9), %s1364_s9, %s892_s25  ;;  %s1104_s15 = smov (!%p292_p9), [#allocation3]  }
  0x16   : > { %v331_v1 = vld [vmem:[%s1356_s1] sm:$0xff]  ;;  %vm387_vm0 = vcmask 23552   ;;  %s327_s24 = scalar_select %p326_p10, %s1179_s8, 1  ;;  %v1103_v2 = vmov 0   ;;  %v346_v3 = vld [vmem:[%s1357_s2 + $0x38] sm:$0xff]  ;;  %v344_v4 = vld [vmem:[%s1357_s2 + $0x28] sm:$0xff] }
  0x17   : > { %924 = vmatprep.mubr.msk.f32.mxu0 %vm387_vm0, %v331_v1  ;;  %1009 = vset.pattern.permute.xlu0 %v1103_v2  ;;  %vm412_vm1 = vcmask 1042432   ;;  %v345_v5 = vld [vmem:[%s1357_s2 + $0x30] sm:$0xff]  ;;  %v343_v6 = vld [vmem:[%s1357_s2 + $0x20] sm:$0xff]  ;;  %v332_v8 = vld [vmem:[%s1356_s1 + $0x8] sm:$0xff]  ;;  %vm557_vm2 = vcmask 523264   ;;  %vm673_vm3 = vcmask 261120  }
  0x18   : > { %1010 = vset.pattern.permute.xlu1 %v1103_v2  ;;  %384 = vperm.xlu0 %1009, %v346_v3   ;;  %s875_s29 = sshll.u32 %s327_s24, 2  ;;  %v333_v9 = vld [vmem:[%s1356_s1 + $0x10] sm:$0xff]  ;;  %v342_v10 = vld [vmem:[%s1357_s2 + $0x18] sm:$0xff]  ;;  %v335_v13 = vld [vmem:[%s1356_s1 + $0x20] sm:$0xff]  ;;  %s811_s24 = sshll.u32 %s325_s26, 4  ;;  %vm794_vm4 = vcmask 1040384   ;;  %s812_s24 = int_to_ptr.vmem [resolvable:$true] %s811_s24 }
  0x19   : > { %374 = vperm.xlu1 %1010, %v344_v4   ;;  %s329_s18 = scalar_lea.vmem %s1355_s0, %s875_s29  ;;  %v341_v11 = vld [vmem:[%s1357_s2 + $0x10] sm:$0xff]  ;;  %v334_v12 = vld [vmem:[%s1356_s1 + $0x18] sm:$0xff]  ;;  %v340_v14 = vld [vmem:[%s1357_s2 + $0x8] sm:$0xff]  ;;  %s798_s29 = scalar_lea.sflag [#allocation4], %s323_s22 }
  0x1a   : > { %v330_v7 = vld [vmem:[%s329_s18] sm:$0x7]  ;;  %v336_v16 = vld [vmem:[%s1356_s1 + $0x28] sm:$0xff]  ;;  %v337_v17 = vld [vmem:[%s1356_s1 + $0x30] sm:$0xff]  ;;  %s1041_s10 = scalar_lea.vmem %s812_s24, 32  ;;  %s1045_s8 = sshll.u32 %s1104_s15, 4  ;;  %s1046_s8 = int_to_ptr.vmem [resolvable:$false] %s1045_s8 }
  0x1b   : > { %922 = vmatprep.subr.msk.mxu0 %vm412_vm1, %v330_v7  ;;  %v339_v15 = vld [vmem:[%s1357_s2] sm:$0xff]  ;;  %v536_v18 = vld [vmem:[%s1359_s4 + $0x18] sm:$0xff]  ;;  %v535_v19 = vld [vmem:[%s1359_s4 + $0x10] sm:$0xff]  ;;  %p1042_p11 = scmp.ne.s32.totalorder %s812_s24, %s1041_s10  ;;  %s1047_s17 = scalar_lea.vmem %s1046_s8, 64 }
  0x1c   : > { %379 = vperm.xlu0 %1009, %v345_v5   ;;  %923 = vmatpush3.msk.msra.mxu0 %vm412_vm1, %v330_v7  ;;  %v338_v20 = vld [vmem:[%s1356_s1 + $0x38] sm:$0xff]  ;;  %v534_v21 = vld [vmem:[%s1359_s4 + $0x8] sm:$0xff]  ;;  %v533_v22 = vld [vmem:[%s1359_s4] sm:$0xff]  ;;  %p1048_p0 = scmp.lt.s32.totalorder %s812_s24, %s1046_s8  ;;  %p1049_p1 = scmp.lt.s32.totalorder %s1047_s17, %s1041_s10 }
  0x1d   : > { %369 = vperm.xlu1 %1010, %v343_v6   ;;  %925 = vmatmul.mubr.msk.f32.vlgmr.msra.gmra.mxu0 %vm387_vm0, %v332_v8  ;;  %v661_v23 = vld [vmem:[%s1361_s6] sm:$0xff]  ;;  %v662_v24 = vld [vmem:[%s1361_s6 + $0x8] sm:$0xff]  ;;  %v531_v62 = vld [vmem:[%s1358_s3 + $0x10] sm:$0xff]  ;;  %p1043_p12 = pnand %p1042_p11, %p1196_p5 }
  0x1e   : > { %927 = vmatprep.mubr.msk.f32.mxu0 %vm387_vm0, %v333_v9  ;;  %v757_v25 = vld [vmem:[%s1362_s7] sm:$0xff]  ;;  %v758_v26 = vld [vmem:[%s1362_s7 + $0x8] sm:$0xff]  ;;  %v532_v63 = vld [vmem:[%s1358_s3 + $0x18] sm:$0xff]  ;;  %p1050_p2 = por %p1049_p1, %p1048_p0 }
  0x1f   : > { %v778_v27 = vld [vmem:[#allocation2] sm:$0x1]  ;;  %v530_v61 = vld [vmem:[%s1358_s3 + $0x8] sm:$0xff]  ;;  %p1044_p13 = pneg %p1043_p12 }
  0x20   : > { %364 = vperm.xlu0 %1009, %v342_v10   ;;  %v529_v28 = vld [vmem:[%s1358_s3] sm:$0xff] }
  0x21   : > { %359 = vperm.xlu1 %1010, %v341_v11   ;;  %928 = vmatmul.mubr.msk.f32.gmra.mxu0 %vm387_vm0, %v334_v12  ;;  %v659_v0 = vld [vmem:[%s1360_s5] sm:$0xff]  ;;  %p1051_p3 = pnand %p1050_p2, %p1044_p13 }
  0x22   : > { %930 = vmatprep.mubr.msk.f32.mxu0 %vm387_vm0, %v335_v13  ;;  %952 = vmatprep.mubr.msk.f32.mxu1 %vm557_vm2, %v529_v28 }
  0x24   : > { %354 = vperm.xlu0 %1009, %v340_v14  }
  0x25   : > { %349 = vperm.xlu1 %1010, %v339_v15   ;;  %931 = vmatmul.mubr.msk.f32.gmra.mxu0 %vm387_vm0, %v336_v16 }
  0x26   : > { %933 = vmatprep.mubr.msk.f32.mxu0 %vm387_vm0, %v337_v17  ;;  %v660_v17 = vld [vmem:[%s1360_s5 + $0x8] sm:$0xff] }
  0x28   : > { %554 = vperm.xlu0 %1009, %v536_v18  }
  0x29   : > { %549 = vperm.xlu1 %1010, %v535_v19   ;;  %934 = vmatmul.mubr.msk.f32.gmra.mxu0 %vm387_vm0, %v338_v20 }
  0x2a   : > { %966 = vmatprep.mubr.msk.f32.mxu0 %vm673_vm3, %v659_v0 }
  0x2c   : > { %544 = vperm.xlu0 %1009, %v534_v21  }
  0x2d   : > { %539 = vperm.xlu1 %1010, %v533_v22  }
  0x30   : > { %665 = vperm.xlu0 %1009, %v661_v23  }
  0x31   : > { %670 = vperm.xlu1 %1010, %v662_v24  }
  0x34   : > { %761 = vperm.xlu0 %1009, %v757_v25  }
  0x35   : > { %766 = vperm.xlu1 %1010, %v758_v26  }
  0x38   : > { %781 = vperm.xlu0 %1009, %v778_v27  }
  0x93   : > { %v385_v31 = vpop.permute.xlu0 %384 }
  0x94   : > { %v375_v33 = vpop.permute.xlu1 %374 }
  0x97   : > { %v380_v36 = vpop.permute.xlu0 %379 }
  0x98   : > { %v370_v38 = vpop.permute.xlu1 %369 }
  0x9b   : > { %v365_v44 = vpop.permute.xlu0 %364 }
  0x9c   : > { %v360_v46 = vpop.permute.xlu1 %359 }
  0x9f   : > { %v355_v49 = vpop.permute.xlu0 %354 }
  0xa0   : > { %v350_v51 = vpop.permute.xlu1 %349 }
  0xa3   : > { %v555_v1 = vpop.permute.xlu0 %554 }
  0xa4   : > { %v550_v3 = vpop.permute.xlu1 %549 }
  0xa7   : > { %v545_v7 = vpop.permute.xlu0 %544 }
  0xa8   : > { %v540_v11 = vpop.permute.xlu1 %539 }
  0xab   : > { %v666_v21 = vpop.permute.xlu0 %665 }
  0xac   : > { %v671_v18 = vpop.permute.xlu1 %670 }
  0xaf   : > { %v762_v26 = vpop.permute.xlu0 %761 }
  0xb0   : > { %v767_v27 = vpop.permute.xlu1 %766 }
  0xdd   : > { %v926_v29 = vpop.f32.mrf.mxu0 }
  0xde   : > { %v488_v50 = vadd.f32 %v926_v29, %v355_v49 }
  0xdf   : > { %v482_v30 = vpop.f32.mrf.mxu0 }
  0xe0   : > { %v483_v52 = vadd.f32 %v482_v30, %v350_v51  ;;  %v784_v30 = vlaneseq }
  0xe1   : > { %v929_v32 = vpop.f32.mrf.mxu0 }
  0xe2   : > { %v498_v47 = vadd.f32 %v929_v32, %v365_v44 }
  0xe3   : > { %v492_v34 = vpop.f32.mrf.mxu0 }
  0xe4   : > { %v493_v48 = vadd.f32 %v492_v34, %v360_v46 }
  0xe5   : > { %v932_v35 = vpop.f32.mrf.mxu0 }
  0xe6   : > { %v508_v42 = vadd.f32 %v932_v35, %v375_v33  ;;  %v785_v33 = vshrl.u32 %v784_v30, 7 }
  0xe7   : > { %v502_v37 = vpop.f32.mrf.mxu0 }
  0xe8   : > { %v503_v45 = vadd.f32 %v502_v37, %v370_v38  ;;  %v782_v38 = vpop.permute.xlu0 %781 }
  0xe9   : > { %v935_v39 = vpop.f32.mrf.mxu0 }
  0xea   : > { %v518_v40 = vadd.f32 %v935_v39, %v385_v31 }
  0xeb   : > { %v512_v41 = vpop.f32.mrf.mxu0 }
  0xec   : > { %1011 = vtanh.f32 %v518_v40  ;;  %v513_v43 = vadd.f32 %v512_v41, %v380_v36  ;;  %v786_v36 = vsub.s32 0, %v785_v33 }
  0xee   : > { %1013 = vtanh.f32 %v513_v43  ;;  %v787_v40 = vrot.slane %v782_v38, %v786_v36 }
  0xef   : > { %1015 = vtanh.f32 %v508_v42 }
  0xf0   : > { %1017 = vtanh.f32 %v503_v45 }
  0xf1   : > { %1019 = vtanh.f32 %v498_v47 }
  0xf2   : > { %1021 = vtanh.f32 %v493_v48 }
  0xf3   : > { %1023 = vtanh.f32 %v488_v50 }
  0xf4   : > { %1025 = vtanh.f32 %v483_v52 }
  0xf9   : > { %v1012_v53 = vpop.eup %1011 }
  0xfa   : > { %936 = vmatprep.subr.mxu1 %v1012_v53 }
  0xfb   : > { %v1014_v54 = vpop.eup %1013  ;;  %937 = vmatpush3.msra.mxu1 %v1012_v53 }
  0xfc   : > { %938 = vmatprep.subr.mxu1 %v1014_v54  ;;  %v1016_v55 = vpop.eup %1015 }
  0xfd   : > { %939 = vmatpush3.msra.mxu1 %v1014_v54  ;;  %v1018_v56 = vpop.eup %1017 }
  0xfe   : > { %940 = vmatprep.subr.mxu1 %v1016_v55  ;;  %v1020_v57 = vpop.eup %1019 }
  0xff   : > { %941 = vmatpush3.msra.mxu1 %v1016_v55  ;;  %v1022_v58 = vpop.eup %1021 }
 0x100   : > { %942 = vmatprep.subr.mxu1 %v1018_v56  ;;  %v1024_v59 = vpop.eup %1023 }
 0x101   : > { %943 = vmatpush3.msra.mxu1 %v1018_v56  ;;  %v1026_v60 = vpop.eup %1025 }
 0x102   : > { %944 = vmatprep.subr.mxu1 %v1020_v57 }
 0x103   : > { %945 = vmatpush3.msra.mxu1 %v1020_v57 }
 0x104   : > { %946 = vmatprep.subr.mxu1 %v1022_v58 }
 0x105   : > { %947 = vmatpush3.msra.mxu1 %v1022_v58 }
 0x106   : > { %948 = vmatprep.subr.mxu1 %v1024_v59 }
 0x107   : > { %949 = vmatpush3.msra.mxu1 %v1024_v59 }
 0x108   : > { %950 = vmatprep.subr.mxu1 %v1026_v60 }
 0x109   : > { %951 = vmatpush3.msra.mxu1 %v1026_v60 }
 0x10a   : > { %953 = vmatmul.mubr.msk.f32.vlgmr.msra.gmra.mxu1 %vm557_vm2, %v530_v61 }
 0x10b   : > { %955 = vmatprep.mubr.msk.f32.mxu1 %vm557_vm2, %v531_v62 }
 0x10e   : > { %956 = vmatmul.mubr.msk.f32.gmra.mxu1 %vm557_vm2, %v532_v63 }
 0x1ca   : > { %v954_v2 = vpop.f32.mrf.mxu1 }
 0x1cb   : > { %v642_v9 = vadd.f32 %v954_v2, %v545_v7 }
 0x1cc   : > { %v636_v4 = vpop.f32.mrf.mxu1 }
 0x1cd   : > { %v637_v12 = vadd.f32 %v636_v4, %v540_v11 }
 0x1ce   : > { %v957_v5 = vpop.f32.mrf.mxu1 }
 0x1cf   : > { %v652_v6 = vadd.f32 %v957_v5, %v555_v1 }
 0x1d0   : > { %v646_v8 = vpop.f32.mrf.mxu1 }
 0x1d1   : > { %1027 = vtanh.f32 %v652_v6  ;;  %v647_v10 = vadd.f32 %v646_v8, %v550_v3 }
 0x1d3   : > { %1029 = vtanh.f32 %v647_v10 }
 0x1d4   : > { %1031 = vtanh.f32 %v642_v9 }
 0x1d5   : > { %1033 = vtanh.f32 %v637_v12 }
 0x1de   : > { %v1028_v13 = vpop.eup %1027 }
 0x1df   : > { %958 = vmatprep.subr.mxu0 %v1028_v13 }
 0x1e0   : > { %v1030_v14 = vpop.eup %1029  ;;  %959 = vmatpush3.msra.mxu0 %v1028_v13 }
 0x1e1   : > { %960 = vmatprep.subr.mxu0 %v1030_v14  ;;  %v1032_v15 = vpop.eup %1031 }
 0x1e2   : > { %961 = vmatpush3.msra.mxu0 %v1030_v14  ;;  %v1034_v16 = vpop.eup %1033 }
 0x1e3   : > { %962 = vmatprep.subr.mxu0 %v1032_v15 }
 0x1e4   : > { %963 = vmatpush3.msra.mxu0 %v1032_v15 }
 0x1e5   : > { %964 = vmatprep.subr.mxu0 %v1034_v16 }
 0x1e6   : > { %965 = vmatpush3.msra.mxu0 %v1034_v16 }
 0x1e7   : > { %967 = vmatmul.mubr.msk.f32.vlgmr.msra.gmra.mxu0 %vm673_vm3, %v660_v17 }
 0x2a7   : > { %v968_v19 = vpop.f32.mrf.mxu0 }
 0x2a8   : > { %v752_v20 = vadd.f32 %v968_v19, %v671_v18 }
 0x2a9   : > { %v746_v22 = vpop.f32.mrf.mxu0 }
 0x2aa   : > { %1035 = vtanh.f32 %v752_v20  ;;  %v747_v23 = vadd.f32 %v746_v22, %v666_v21 }
 0x2ac   : > { %1037 = vtanh.f32 %v747_v23 }
 0x2b7   : > { %v1036_v24 = vpop.eup %1035 }
 0x2b8   : > { %v770_v28 = vmul.f32 %v1036_v24, %v767_v27 }
 0x2b9   : > { %v1038_v25 = vpop.eup %1037 }
 0x2ba   : > { %v769_v29 = vmul.f32 %v1038_v25, %v762_v26 }
 0x2bc   : > { %v771_v31 = vadd.f32 %v770_v28, %v769_v29 }
 0x2be   : > { %v772_v32 = vrot.slane %v771_v31, 4 }
 0x2c0   : > { %v773_v34 = vadd.f32 %v772_v32, %v771_v31 }
 0x2c2   : > { %v774_v35 = vrot.slane %v773_v34, 2 }
 0x2c4   : > { %v775_v37 = vadd.f32 %v774_v35, %v773_v34 }
 0x2c6   : > { %v776_v39 = vrot.slane %v775_v37, 1 }
 0x2c8   : > { %v777_v41 = vadd.f32 %v776_v39, %v775_v37 }
 0x2ca   : > { %v788_v42 = vadd.f32 %v787_v40, %v777_v41 }
 0x2cc   : > { %v789_v43 = vmul.f32 0.5, %v788_v42 }
 0x2ce   : > { %1039 = vtanh.f32 %v789_v43 }
 0x2db   : > { %v1040_v44 = vpop.eup %1039 }
 0x2dc   : > { %v791_v45 = vadd.f32 1.0, %v1040_v44 }
 0x2de   : > { %v792_v46 = vmul.f32 0.5, %v791_v45 }
 0x2e0   : > { %v793_v47 = vsub.f32 1.0, %v792_v46 }
 0x2e2   : > { %v795_v48 = vsel %vm794_vm4, %v793_v47, %v792_v46 }
 0x2e3   : > { %796 = vst [vmem:[%s325_s26] sm:$0x3] %v795_v48 }
 0x2e4   : > { %1054 = shalt.err (!%p1051_p3)
}
 0x2e5   : > { %s1055_s18 = scalar_lea.hbm %s1320_s30, 32  ;;  %s1059_s25 = scalar_lea.hbm %s1364_s9, 64 }
 0x2e6   : > { %p1056_p4 = scmp.ne.s32.totalorder %s1320_s30, %s1055_s18  ;;  %p1060_p9 = scmp.lt.s32.totalorder %s1320_s30, %s1364_s9 }
 0x2e7   : > { %p1061_p10 = scmp.lt.s32.totalorder %s1059_s25, %s1055_s18 }
 0x2e8   : > { %p1057_p7 = pnand %p1056_p4, %p1196_p5 }
 0x2e9   : > { %p1062_p11 = por %p1061_p10, %p1060_p9 }
 0x2ea   : > { %p1058_p8 = pneg %p1057_p7 }
 0x2ec   : > { %p1063_p12 = pnand %p1062_p11, %p1058_p8 }
 0x2ee   : > { %1066 = shalt.err (!%p1063_p12)
}
 0x2ef   : > { %969 = dma.vmem_to_hbm [thread:$0]  (%p1196_p5), %s812_s24, 32, %s1320_s30, %s798_s29  }
 0x2f0 PF: > { %p975_p13 = scmp.ge.s32.totalorder %s1101_s14, 2  ;;  %s823_s28 = sand.u32 1, %s1089_s11  }
 0x2f1   : > { %s824_s10 = scalar_lea.sflag [#allocation4], %s823_s28 }
 0x2f2   : > { %p972_p0 = pnand %p975_p13, %p1200_p6 }
 0x2f4   : > { %p973_p1 = pneg %p972_p0 }
 0x2f6   : > { %1084 = dma.done.wait (%p973_p1), %s824_s10, 32  }
 0x2f7   : > { %1086 = vsyncadd (%p973_p1), %s824_s10, 4294967264  ;;  %p21_p2 = scmp.ge.s32.totalorder %s1183_s16, 4   ;;  %s1367_s11 = smov %s1093_s12 }
 0x2f8   : > { %s1368_s12 = smov %s1097_s13  ;;  %s1369_s13 = smov %s1194_s19 }
 0x2f9   : > { %s1370_s14 = smov %s1183_s16  ;;  %23 = sbr.rel (!%p21_p2) target bundleno = 6 (0x6), region = 91 }
 0x2fe   :  { %829 = vsyncpa [#allocation4], 1 }
 0x2ff   :  { %831 = vsyncpa [#allocation4 + $0x1], 1 }

</bundles_post_ra>
